<compile_context>
chip_gen: v6e
topology: v6e:2x2x1
jax: 0.10.0
libtpu: 0.0.40
codegen_flags: <defaults>
</compile_context>

<pallas_src>
import jax
import jax.numpy as jnp
from jax.experimental import pallas as pl
from jax.experimental.pallas import tpu as pltpu

_MIB = 1024 * 1024


def _round_up(a: int, b: int) -> int:
    return b * ((a + b - 1) // b)


def _vmem_capacity_bytes() -> int:
    """Physical VMEM per core; conservative v7x-sized fallback if the query fails."""
    try:
        info = pltpu.get_tpu_info()
        cap = getattr(info, "vmem_capacity_bytes", None)
        if cap:
            return int(cap)
    except Exception:
        pass
    return 64 * _MIB


def _is_big_vmem() -> bool:
    # v5e / v6e have 128 MiB VMEM per TensorCore; v7x has 64 MiB.
    return _vmem_capacity_bytes() >= 100 * _MIB


# --------------------------------------------------------------------------------------
# Kernel
# --------------------------------------------------------------------------------------
def _swiglu_ffn_kernel(x_ref, wgu_ref, wd_ref, o_ref, acc_ref):
    """Grid = (token tiles i [parallel], intermediate tiles j [arbitrary, reduction]).

    x_ref  : (TM, H)        bf16 token tile (same block for every j)
    wgu_ref: (1, H, 2*TI)   packed [gate | up] weight block j, (in, out) layout
    wd_ref : (TI, H)        down_proj weight block j, (in, out) layout
    o_ref  : (TM, H)        output tile (written once, at the last j)
    acc_ref: (TM, H)        f32 accumulator scratch (resident across j)
    """
    j = pl.program_id(1)

    @pl.when(j == 0)
    def _():
        acc_ref[...] = jnp.zeros_like(acc_ref)

    x = x_ref[...]                                                     # (TM, H) bf16
    wgu = wgu_ref[0]                                                   # (H, 2*TI) bf16
    gu = jnp.dot(x, wgu, preferred_element_type=jnp.float32)           # (TM, 2*TI) f32
    ti = gu.shape[1] // 2
    gate = gu[:, :ti]
    up = gu[:, ti:]
    # SiLU(gate) * up in f32 (matches torch.nn.SiLU / ACT2FN['silu'])
    h = (gate * jax.nn.sigmoid(gate)) * up
    acc_ref[...] += jnp.dot(h.astype(x_ref.dtype), wd_ref[...],
                            preferred_element_type=jnp.float32)

    @pl.when(j == pl.num_programs(1) - 1)
    def _():
        o_ref[...] = acc_ref[...].astype(o_ref.dtype)


# --------------------------------------------------------------------------------------
# One-time parameter preparation (parameter creation time, NOT per forward call)
# --------------------------------------------------------------------------------------
def select_inter_tile(intermediate_size: int, inter_tile=None) -> int:
    if inter_tile is None:
        inter_tile = 1024 if _is_big_vmem() else 512
    inter_tile = min(inter_tile, _round_up(intermediate_size, 128))
    assert inter_tile % 128 == 0, "inter tile must be a multiple of 128 (lane width)"
    return inter_tile


def prepare_ffn_params(wg_t, wu_t, wd_t, *, inter_tile=None, compute_dtype=jnp.bfloat16):
    """Weights already in (in_features, out_features) layout:
         wg_t, wu_t: (H, I); wd_t: (I, H).
    Casts to the compute dtype, zero-pads I to a multiple of the intermediate tile
    (exact for SwiGLU: silu(0)*0 = 0, zero rows of W_down contribute nothing) and packs
    gate/up into a (n_blocks, H, 2*ti) tile-interleaved tensor. Done once, cached.
    """
    H, I = wg_t.shape
    assert wg_t.shape == (H, I) and wu_t.shape == (H, I) and wd_t.shape == (I, H)
    assert H % 128 == 0, "hidden_size must be a multiple of 128 (lane-dense output)"

    ti = select_inter_tile(I, inter_tile)
    I_pad = _round_up(I, ti)

    wg = wg_t.astype(compute_dtype)
    wu = wu_t.astype(compute_dtype)
    wd = wd_t.astype(compute_dtype)
    if I_pad != I:
        wg = jnp.pad(wg, ((0, 0), (0, I_pad - I)))
        wu = jnp.pad(wu, ((0, 0), (0, I_pad - I)))
        wd = jnp.pad(wd, ((0, I_pad - I), (0, 0)))

    nblk = I_pad // ti
    wg3 = wg.reshape(H, nblk, ti).transpose(1, 0, 2)   # (nblk, H, ti)
    wu3 = wu.reshape(H, nblk, ti).transpose(1, 0, 2)   # (nblk, H, ti)
    wgu = jnp.concatenate([wg3, wu3], axis=-1)         # (nblk, H, 2*ti)

    return dict(wgu=wgu, wd=wd, hidden=H, inter=I, inter_pad=I_pad, ti=ti,
                compute_dtype=compute_dtype)


# --------------------------------------------------------------------------------------
# Forward
# --------------------------------------------------------------------------------------
def enhanced_feed_forward(x, params, *, token_tile=None, vmem_limit_bytes=None,
                          out_dtype=None):
    """x: (..., H).  params: output of prepare_ffn_params().  dropout=0.0 -> identity."""
    H = params["hidden"]
    ti = params["ti"]
    wgu = params["wgu"]
    wd = params["wd"]
    I_pad = params["inter_pad"]
    compute_dtype = params["compute_dtype"]

    assert x.shape[-1] == H
    lead_shape = x.shape[:-1]
    T = 1
    for d in lead_shape:
        T *= d
    out_dtype = out_dtype if out_dtype is not None else x.dtype

    big_vmem = _is_big_vmem()
    if token_tile is None:
        # big-VMEM chips (v5e/v6e) get a big token tile to stay above the weight-stream
        # roofline knee; v7x is capped to fit 64 MiB VMEM.
        token_tile = 1024 if big_vmem else 512
    if vmem_limit_bytes is None:
        vmem_limit_bytes = min(_vmem_capacity_bytes() - 8 * _MIB,
                               (100 if big_vmem else 56) * _MIB)

    # Token tile: multiple of 128, no larger than needed for this T.
    tm = max(128, _round_up(min(token_tile, T), 128))
    T_pad = _round_up(T, tm)
    # v7x megacore occupancy: give both TensorCores at least one token tile when T allows.
    if (not big_vmem) and T_pad // tm < 2 and T_pad >= 256:
        tm = max(128, 128 * ((T_pad // 2) // 128))
        T_pad = _round_up(T, tm)

    x2d = x.reshape(T, H).astype(compute_dtype)
    if T_pad != T:
        x2d = jnp.pad(x2d, ((0, T_pad - T), (0, 0)))  # zero rows, sliced off afterwards

    grid = (T_pad // tm, I_pad // ti)

    out2d = pl.pallas_call(
        _swiglu_ffn_kernel,
        out_shape=jax.ShapeDtypeStruct((T_pad, H), out_dtype),
        grid_spec=pltpu.PrefetchScalarGridSpec(
            num_scalar_prefetch=0,
            grid=grid,
            in_specs=[
                pl.BlockSpec((tm, H), lambda i, j: (i, 0)),          # x tile (reused over j)
                pl.BlockSpec((1, H, 2 * ti), lambda i, j: (j, 0, 0)),  # packed gate|up block j
                pl.BlockSpec((ti, H), lambda i, j: (j, 0)),          # down_proj block j
            ],
            out_specs=pl.BlockSpec((tm, H), lambda i, j: (i, 0)),    # resident over j
            scratch_shapes=[pltpu.VMEM((tm, H), jnp.float32)],       # f32 accumulator
        ),
        compiler_params=pltpu.CompilerParams(
            dimension_semantics=("parallel", "arbitrary"),           # reduction axis last
            vmem_limit_bytes=int(vmem_limit_bytes),
        ),
    )(x2d, wgu, wd)

    return out2d[:T].reshape(*lead_shape, H)


# --------------------------------------------------------------------------------------
# Reference (pure JAX, same bf16 matmul / f32 accumulation recipe)
# --------------------------------------------------------------------------------------
def _reference_ffn(x, wg_t, wu_t, wd_t, compute_dtype=jnp.bfloat16):
    xd = x.astype(compute_dtype)
    gate = jnp.dot(xd, wg_t.astype(compute_dtype), preferred_element_type=jnp.float32)
    up = jnp.dot(xd, wu_t.astype(compute_dtype), preferred_element_type=jnp.float32)
    h = (gate * jax.nn.sigmoid(gate)) * up
    out = jnp.dot(h.astype(compute_dtype), wd_t.astype(compute_dtype),
                  preferred_element_type=jnp.float32)
    return out.astype(x.dtype)


if __name__ == "__main__":
    # Small config consistent with MiniMindConfig sizing rule:
    # hidden_size = 128 -> intermediate_size = 64 * ceil(int(128*8/3)/64) = 384
    B, S, H = 2, 8, 128
    I = 64 * ((int(H * 8 / 3) + 63) // 64)  # = 384

    key = jax.random.PRNGKey(0)
    kx, kg, ku, kd = jax.random.split(key, 4)

    init_std = 0.02  # config.init_std, weight_init_method='normal'
    x = jax.random.normal(kx, (B, S, H), dtype=jnp.float32)
    # Parameters are created once, already transposed to (in, out) layout
    # (equivalent to torch Linear weight.T done at parameter creation, not per call).
    wg_t = init_std * jax.random.normal(kg, (H, I), dtype=jnp.float32)
    wu_t = init_std * jax.random.normal(ku, (H, I), dtype=jnp.float32)
    wd_t = init_std * jax.random.normal(kd, (I, H), dtype=jnp.float32)

    ref = _reference_ffn(x, wg_t, wu_t, wd_t, compute_dtype=jnp.bfloat16)

    # 1) Small explicit tiles to exercise the multi-block reduction loop (grid (1, 3)).
    params_small = prepare_ffn_params(wg_t, wu_t, wd_t, inter_tile=128)
    out1 = enhanced_feed_forward(x, params_small, token_tile=128)
    out1 = jax.block_until_ready(out1)
    assert out1.shape == (B, S, H)
    err1 = float(jnp.max(jnp.abs(out1 - ref)))
    assert jnp.allclose(out1, ref, atol=5e-4, rtol=5e-3), f"mismatch (tiled) max|err|={err1}"

    # 2) Generation-aware default tiles / VMEM limit (what a real model would use).
    params_auto = prepare_ffn_params(wg_t, wu_t, wd_t)
    out2 = enhanced_feed_forward(x, params_auto)
    out2 = jax.block_until_ready(out2)
    assert out2.shape == (B, S, H)
    err2 = float(jnp.max(jnp.abs(out2 - ref)))
    assert jnp.allclose(out2, ref, atol=5e-4, rtol=5e-3), f"mismatch (auto) max|err|={err2}"

    print("KERNEL_OK")
</pallas_src>

<mosaic_0001>
module attributes {stable_mosaic.version = 11 : i64} {
  func.func @_swiglu_ffn_kernel(%arg0: i32, %arg1: i32, %arg2: memref<128x128xbf16, #tpu.memory_space<vmem>>, %arg3: memref<1x128x256xbf16, #tpu.memory_space<vmem>>, %arg4: memref<128x128xbf16, #tpu.memory_space<vmem>>, %arg5: memref<128x128xf32, #tpu.memory_space<vmem>>, %arg6: memref<128x128xf32, #tpu.memory_space<vmem>>) attributes {dimension_semantics = [#tpu.dimension_semantics<parallel>, #tpu.dimension_semantics<arbitrary>], iteration_bounds = array<i64: 1, 3>, scalar_prefetch = 0 : i64, scratch_operands = 1 : i64, tpu.core_type = #tpu.core_type<tc>, window_params = [{transform_indices = @transform_0, window_bounds = array<i64: 128, 128>}, {transform_indices = @transform_1, window_bounds = array<i64: 1, 128, 256>}, {transform_indices = @transform_2, window_bounds = array<i64: 128, 128>}, {transform_indices = @transform_3, window_bounds = array<i64: 128, 128>}]} {
    %c0_i32 = arith.constant 0 : i32
    %0 = arith.cmpi eq, %arg1, %c0_i32 : i32
    %1 = arith.extui %0 : i1 to i32
    %c0_i32_0 = arith.constant 0 : i32
    %2 = arith.cmpi ne, %1, %c0_i32_0 : i32
    scf.if %2 {
      %cst_14 = arith.constant 0.000000e+00 : f32
      %25 = vector.broadcast %cst_14 : f32 to vector<128x128xf32>
      %c0_15 = arith.constant 0 : index
      %c0_16 = arith.constant 0 : index
      %26 = vector.load %arg6[%c0_15, %c0_16] : memref<128x128xf32, #tpu.memory_space<vmem>>, vector<128x128xf32>
      tpu.vector_store %arg6[%c0_15, %c0_16], %25 {strides = array<i32>} : memref<128x128xf32, #tpu.memory_space<vmem>>, vector<128x128xf32>,
    } else {
    }
    %c0 = arith.constant 0 : index
    %c0_1 = arith.constant 0 : index
    %3 = vector.load %arg2[%c0, %c0_1] : memref<128x128xbf16, #tpu.memory_space<vmem>>, vector<128x128xbf16>
    %c0_2 = arith.constant 0 : index
    %c0_3 = arith.constant 0 : index
    %c0_4 = arith.constant 0 : index
    %4 = vector.load %arg3[%c0_2, %c0_3, %c0_4] : memref<1x128x256xbf16, #tpu.memory_space<vmem>>, vector<1x128x256xbf16>
    %5 = vector.shape_cast %4 : vector<1x128x256xbf16> to vector<128x256xbf16>
    %cst = arith.constant dense<0.000000e+00> : vector<128x256xf32>
    %6 = tpu.matmul %3, %5, %cst {dimension_numbers = #tpu.dot_dimension_numbers<[1], [0], [0], [1], [0, 0, 1, 1], [], []>} : vector<128x128xbf16>, vector<128x256xbf16>, vector<128x256xf32> -> vector<128x256xf32>
    %7 = vector.extract_strided_slice %6 {offsets = [0, 0], sizes = [128, 128], strides = [1, 1]} : vector<128x256xf32> to vector<128x128xf32>
    %8 = vector.extract_strided_slice %6 {offsets = [0, 128], sizes = [128, 128], strides = [1, 1]} : vector<128x256xf32> to vector<128x128xf32>
    %9 = arith.negf %7 : vector<128x128xf32>
    %10 = math.exp %9 : vector<128x128xf32>
    %cst_5 = arith.constant 1.000000e+00 : f32
    %11 = vector.broadcast %cst_5 : f32 to vector<128x128xf32>
    %12 = arith.addf %11, %10 : vector<128x128xf32>
    %13 = arith.divf %11, %12 : vector<128x128xf32>
    %14 = arith.mulf %7, %13 : vector<128x128xf32>
    %15 = arith.mulf %14, %8 : vector<128x128xf32>
    %c0_6 = arith.constant 0 : index
    %c0_7 = arith.constant 0 : index
    %16 = vector.load %arg6[%c0_6, %c0_7] : memref<128x128xf32, #tpu.memory_space<vmem>>, vector<128x128xf32>
    %17 = arith.truncf %15 : vector<128x128xf32> to vector<128x128xbf16>
    %c0_8 = arith.constant 0 : index
    %c0_9 = arith.constant 0 : index
    %18 = vector.load %arg4[%c0_8, %c0_9] : memref<128x128xbf16, #tpu.memory_space<vmem>>, vector<128x128xbf16>
    %cst_10 = arith.constant dense<0.000000e+00> : vector<128x128xf32>
    %19 = tpu.matmul %17, %18, %cst_10 {dimension_numbers = #tpu.dot_dimension_numbers<[1], [0], [0], [1], [0, 0, 1, 1], [], []>} : vector<128x128xbf16>, vector<128x128xbf16>, vector<128x128xf32> -> vector<128x128xf32>
    %20 = arith.addf %16, %19 : vector<128x128xf32>
    %c0_11 = arith.constant 0 : index
    %c0_12 = arith.constant 0 : index
    %21 = vector.load %arg6[%c0_11, %c0_12] : memref<128x128xf32, #tpu.memory_space<vmem>>, vector<128x128xf32>
    tpu.vector_store %arg6[%c0_11, %c0_12], %20 {strides = array<i32>} : memref<128x128xf32, #tpu.memory_space<vmem>>, vector<128x128xf32>,
    %c2_i32 = arith.constant 2 : i32
    %22 = arith.cmpi eq, %arg1, %c2_i32 : i32
    %23 = arith.extui %22 : i1 to i32
    %c0_i32_13 = arith.constant 0 : i32
    %24 = arith.cmpi ne, %23, %c0_i32_13 : i32
    scf.if %24 {
      %c0_14 = arith.constant 0 : index
      %c0_15 = arith.constant 0 : index
      %25 = vector.load %arg6[%c0_14, %c0_15] : memref<128x128xf32, #tpu.memory_space<vmem>>, vector<128x128xf32>
      %c0_16 = arith.constant 0 : index
      %c0_17 = arith.constant 0 : index
      %26 = vector.load %arg5[%c0_16, %c0_17] : memref<128x128xf32, #tpu.memory_space<vmem>>, vector<128x128xf32>
      tpu.vector_store %arg5[%c0_16, %c0_17], %25 {strides = array<i32>} : memref<128x128xf32, #tpu.memory_space<vmem>>, vector<128x128xf32>,
    } else {
    }
    return
  }
  func.func @transform_0(%arg0: i32, %arg1: i32) -> (i32, i32) {
    %c0_i32 = arith.constant 0 : i32
    %c0_i32_0 = arith.constant 0 : i32
    return %arg0, %c0_i32 : i32, i32
  }
  func.func @transform_1(%arg0: i32, %arg1: i32) -> (i32, i32, i32) {
    %c0_i32 = arith.constant 0 : i32
    %c0_i32_0 = arith.constant 0 : i32
    %c0_i32_1 = arith.constant 0 : i32
    return %arg1, %c0_i32, %c0_i32_0 : i32, i32, i32
  }
  func.func @transform_2(%arg0: i32, %arg1: i32) -> (i32, i32) {
    %c0_i32 = arith.constant 0 : i32
    %c0_i32_0 = arith.constant 0 : i32
    return %arg1, %c0_i32 : i32, i32
  }
  func.func @transform_3(%arg0: i32, %arg1: i32) -> (i32, i32) {
    %c0_i32 = arith.constant 0 : i32
    %c0_i32_0 = arith.constant 0 : i32
    return %arg0, %c0_i32 : i32, i32
  }
}

</mosaic_0001>

<bundles_post_ra>
// kernel: tpu_custom_call.1
= control target key start
LH: loop header
LB: loop body
LE: loop exit
PB: predicated region body
PF: predicated region fallthrough
CT: control target
= control target key end

     0   :  { %8 = vsyncpa [#allocation4], 0  ;;  %s1811_s0 = inlined_call_operand.hbm [shape: bf16[128,128], index: 0, kind: input, shape index: {}]   ;;  %s1812_s1 = inlined_call_operand.hbm [shape: bf16[3,128,256], index: 1, kind: input, shape index: {}]   ;;  %s1813_s2 = inlined_call_operand.hbm [shape: bf16[384,128], index: 2, kind: input, shape index: {}]   ;;  %s1814_s3 = inlined_call_operand.hbm [shape: f32[128,128], index: 3, kind: output, shape index: {}]  }
   0x1   :  { %9 = vsyncpa [#allocation7], 0 }
   0x2   :  { %11 = vsyncpa [#allocation7 + $0x1], 0 }
   0x3   :  { %12 = vsyncpa [#allocation5], 0  ;;  %s1545_s12 = smov 0   ;;  %s1547_s13 = smov 0  }
   0x4   :  { %s1549_s14 = smov 0   ;;  %s1551_s15 = smov 0  }
   0x5   :  { %s1553_s16 = smov 0   ;;  %s1555_s17 = smov 0  }
   0x6 LB: > { %s27_s18 = sadd.s32 1, %s1507_s16  ;;  %s63_s19 = sadd.s32 1, %s1499_s14  ;;  %s1511_s17 = sphi %s1555_s17, %s18_s17   ;;  %s1507_s16 = sphi %s1553_s16, %s1823_s16   ;;  %s1503_s15 = sphi %s1551_s15, %s1822_s15   ;;  %s1499_s14 = sphi %s1549_s14, %s1821_s14   ;;  %s1495_s13 = sphi %s1547_s13, %s1820_s13   ;;  %s1491_s12 = sphi %s1545_s12, %s1819_s12  }
   0x7   : > { %p28_p0 = scmp.ge.s32.totalorder %s27_s18, 3  ;;  %p70_p1 = scmp.ne.s32.totalorder %s1499_s14, %s1495_s13 }
   0x8   : > { %p71_p2 = scmp.eq.s32.totalorder %s1511_s17, 0  ;;  %p1181_p4 = scmp.lt.s32.totalorder %s1511_s17, 3 }
   0x9   : > { %s1825_s18 = smov (%p28_p0, %s27_s18), 0  ;;  %s168_s21 = sand.u32 1, %s1511_s17  }
   0xa   : > { %p72_p3 = por %p71_p2, %p70_p1  ;;  %s60_s20 = ssub.s32 %s1507_s16, %s1825_s18 }
   0xb   : > { %p61_p5 = scmp.eq.s32.totalorder %s60_s20, 0  ;;  %s170_s22 = sand.u32 1, %s1499_s14  }
   0xc   : > { %s1107_s23 = sshll.u32 %s1507_s16, 11  ;;  %s1043_s25 = sshll.u32 %s170_s22, 7 }
   0xd   : > { %s1589_s24 = scalar_select %p61_p5, %s1499_s14, %s63_s19  }
   0xe   : > { %s178_s28 = scalar_lea.hbm %s1812_s1, %s1107_s23  ;;  %p1594_p6 = pnand %p1181_p4, %p72_p3 }
   0xf   : > { %s172_s30 = scalar_lea.vmem [#allocation6], %s1043_s25  ;;  %s1046_s5 = sshll.u32 %s170_s22, 6 }
  0x10   : > { %s179_s4 = sshll.u32 %s172_s30, 4  ;;  %s1598_s6 = scalar_lea.sflag [#allocation7], %s168_s21  ;;  %s180_s4 = int_to_ptr.vmem [resolvable:$true] %s179_s4 }
  0x11   : > { %p1349_p7 = pneg %p1594_p6  ;;  %s1360_s7 = scalar_lea.vmem %s180_s4, 2048 }
  0x12   : > { %p1361_p8 = scmp.ne.s32.totalorder %s180_s4, %s1360_s7  ;;  %s1513_s8 = smov [#allocation6]  }
  0x13   : > { %s1365_s9 = sshll.u32 %s1513_s8, 4  ;;  %s1366_s9 = int_to_ptr.vmem [resolvable:$false] %s1365_s9 }
  0x14   : > { %p1363_p9 = pnand %p1361_p8, %p1349_p7  ;;  %s1367_s10 = scalar_lea.vmem %s1366_s9, 4096 }
  0x15   : > { %p1368_p11 = scmp.lt.s32.totalorder %s180_s4, %s1366_s9  ;;  %p1369_p12 = scmp.lt.s32.totalorder %s1367_s10, %s1360_s7 }
  0x16   : > { %p1364_p10 = pneg %p1363_p9 }
  0x17   : > { %p1370_p13 = por %p1369_p12, %p1368_p11 }
  0x19   : > { %p1371_p0 = pnand %p1370_p13, %p1364_p10 }
  0x1b   : > { %1374 = shalt.err (!%p1371_p0)
}
  0x1c   : > { %s1514_s11 = smov 128   ;;  %s1515_s19 = smov 8  }
  0x1d   : > { %1176 = dma.hbm_to_vmem [thread:$0]  (!%p1594_p6), %s178_s28, 2048, %s180_s4, %s1598_s6, %s1514_s11, %s1514_s11, %s1515_s19  }
  0x1e   : > { %s193_s20 = scalar_lea.vmem [#allocation8], %s1046_s5  ;;  %s1609_s22 = sadd.s32 4294967295, %s1511_s17  }
  0x1f   : > { %s200_s21 = sshll.u32 %s193_s20, 4  ;;  %p76_p1 = scmp.ne.s32.totalorder %s1495_s13, %s1491_s12  ;;  %s201_s21 = int_to_ptr.vmem [resolvable:$true] %s200_s21 }
  0x20   : > { %p77_p2 = scmp.eq.s32.totalorder %s1609_s22, 0  ;;  %p1040_p3 = scmp.ge.s32.totalorder %s1511_s17, 1 }
  0x21   : > { %p139_p4 = scmp.lt.s32.totalorder %s1511_s17, 4  ;;  %s1516_s26 = smov [#allocation3]  }
  0x22   : > { %p1618_p5 = por %p77_p2, %p76_p1  ;;  %s154_s27 = sshll.u32 %s1516_s26, 4  ;;  %s1626_s27 = int_to_ptr.vmem [resolvable:$true] %s154_s27 }
  0x23   : > { %p1622_p8 = pnand %p1040_p3, %p139_p4  ;;  %s1108_s12 = sshll.u32 %s1507_s16, 10 }
  0x24   : > { %s199_s5 = scalar_lea.hbm %s1813_s2, %s1108_s12  ;;  %s1388_s7 = scalar_lea.vmem %s201_s21, 1024 }
  0x25   : > { %p1169_p9 = pneg %p1622_p8  ;;  %p1389_p11 = scmp.ne.s32.totalorder %s201_s21, %s1388_s7 }
  0x26   : > { %s1517_s8 = smov [#allocation8]  }
  0x27   : > { %p1633_p10 = pnand %p1169_p9, %p77_p2  ;;  %p1391_p12 = pnand %p1389_p11, %p1349_p7 }
  0x28   : > { %s1393_s9 = sshll.u32 %s1517_s8, 4  ;;  %s1394_s9 = int_to_ptr.vmem [resolvable:$false] %s1393_s9 }
  0x29   : > { %p1392_p13 = pneg %p1391_p12  ;;  %s1395_s10 = scalar_lea.vmem %s1394_s9, 2048 }
  0x2a   : > { %p1396_p0 = scmp.lt.s32.totalorder %s201_s21, %s1394_s9  ;;  %p1397_p1 = scmp.lt.s32.totalorder %s1395_s10, %s1388_s7 }
  0x2c   : > { %p1398_p3 = por %p1397_p1, %p1396_p0 }
  0x2e   : > { %p1399_p4 = pnand %p1398_p3, %p1392_p13 }
  0x30   : > { %1402 = shalt.err (!%p1399_p4)
}
  0x31   : > { %s1518_s11 = smov 64   ;;  %s1519_s19 = smov 4  }
  0x32   : > { %1179 = dma.hbm_to_vmem [thread:$0]  (!%p1594_p6), %s199_s5, 1024, %s201_s21, %s1598_s6, %s1518_s11, %s1518_s11, %s1519_s19  }
  0x33   : > { %p1405_p7 = pneg %p1633_p10  ;;  %s1414_s20 = scalar_lea.vmem %s1626_s27, 1024 }
  0x34   : > { %p1415_p9 = scmp.ne.s32.totalorder %s1626_s27, %s1414_s20  ;;  %p1422_p0 = scmp.lt.s32.totalorder %s1626_s27, %s1626_s27 }
  0x35   : > { %p1423_p13 = scmp.lt.s32.totalorder %s1414_s20, %s1414_s20 }
  0x36   : > { %p1417_p11 = pnand %p1415_p9, %p1405_p7 }
  0x37   : > { %p1424_p1 = por %p1423_p13, %p1422_p0 }
  0x38   : > { %p1418_p12 = pneg %p1417_p11 }
  0x3a   : > { %p1425_p3 = pnand %p1424_p1, %p1418_p12 }
  0x3c   : > { %1428 = shalt.err (!%p1425_p3)
}
  0x3d   : > { %1172 = dma.hbm_to_vmem [thread:$0]  (!%p1633_p10), %s1811_s0, 1024, %s1626_s27, [#allocation4], %s1518_s11, %s1518_s11, %s1519_s19  }
  0x3e   : > { %212 = sbr.rel (%p1622_p8) target bundleno = 640 (0x280), region = 32 }
  0x43   : > { %1478 = dma.done.wait (%p77_p2), [#allocation4], 1024  }
  0x44   : > { %1480 = vsyncadd (%p77_p2), [#allocation4], 4294966272  ;;  %s218_s29 = sand.u32 1, %s1609_s22   ;;  %s220_s6 = sand.u32 1, %s1495_s13  }
  0x45   : > { %s1051_s21 = sshll.u32 %s220_s6, 7  ;;  %s219_s28 = scalar_lea.sflag [#allocation7], %s218_s29 }
  0x46   : > { %s1666_s30 = scalar_lea.vmem [#allocation6], %s1051_s21 }
  0x47   : > { %1482 = dma.done.wait (%p1618_p5), %s219_s28, 3072  }
  0x48   : > { %1484 = vsyncadd (%p1618_p5), %s219_s28, 4294964224  ;;  %s1052_s25 = sshll.u32 %s220_s6, 6  ;;  %p1053_p6 = scmp.ne.s32.totalorder %s1503_s15, 0 }
  0x49   : > { %s1672_s27 = scalar_lea.vmem [#allocation8], %s1052_s25 }
  0x4a   : > { %261 = sbr.rel (%p1053_p6) target bundleno = 88 (0x58), region = 48 }
  0x4f   : > { %v1520_v0 = vmov 0.0  }
  0x50   : > { %262 = vst [vmem:[#allocation2 + $0x30] sm:$0xff] %v1520_v0  ;;  %263 = vst [vmem:[#allocation2] sm:$0xff] %v1520_v0 }
  0x51   : > { %264 = vst [vmem:[#allocation2 + $0x58] sm:$0xff] %v1520_v0  ;;  %265 = vst [vmem:[#allocation2 + $0x18] sm:$0xff] %v1520_v0 }
  0x52   : > { %266 = vst [vmem:[#allocation2 + $0x50] sm:$0xff] %v1520_v0  ;;  %267 = vst [vmem:[#allocation2 + $0x68] sm:$0xff] %v1520_v0 }
  0x53   : > { %268 = vst [vmem:[#allocation2 + $0x8] sm:$0xff] %v1520_v0  ;;  %269 = vst [vmem:[#allocation2 + $0x48] sm:$0xff] %v1520_v0 }
  0x54   : > { %270 = vst [vmem:[#allocation2 + $0x40] sm:$0xff] %v1520_v0  ;;  %271 = vst [vmem:[#allocation2 + $0x20] sm:$0xff] %v1520_v0 }
  0x55   : > { %272 = vst [vmem:[#allocation2 + $0x10] sm:$0xff] %v1520_v0  ;;  %273 = vst [vmem:[#allocation2 + $0x38] sm:$0xff] %v1520_v0 }
  0x56   : > { %274 = vst [vmem:[#allocation2 + $0x60] sm:$0xff] %v1520_v0  ;;  %275 = vst [vmem:[#allocation2 + $0x70] sm:$0xff] %v1520_v0 }
  0x57   : > { %276 = vst [vmem:[#allocation2 + $0x78] sm:$0xff] %v1520_v0  ;;  %277 = vst [vmem:[#allocation2 + $0x28] sm:$0xff] %v1520_v0 }
  0x58 PF: > { %v1243_v1 = vld [vmem:[%s1666_s30 + $0x74] ss:$8 sps:$4 sm:$0xff]   ;;  %v1245_v2 = vld [vmem:[%s1666_s30 + $0x70] ss:$8 sps:$4 sm:$0xff]   ;;  %v1521_v3 = vmov 0   ;;  %v1267_v18 = vld [vmem:[#allocation3] sm:$0xff]  }
  0x59   : > { %470 = vmatprep.mubr.bf16.mxu0 %v1521_v3  ;;  %438 = vmatprep.subr.bf16.mxu0 %v1243_v1  ;;  %v1246_v4 = vld [vmem:[%s1666_s30 + $0x64] ss:$8 sps:$4 sm:$0xff]   ;;  %v1248_v5 = vld [vmem:[%s1666_s30 + $0x60] ss:$8 sps:$4 sm:$0xff]   ;;  %v1249_v6 = vld [vmem:[%s1666_s30 + $0x54] ss:$8 sps:$4 sm:$0xff]  }
  0x5a   : > { %439 = vmatpush1.bf16.msra.mxu0 %v1245_v2  ;;  %v1251_v7 = vld [vmem:[%s1666_s30 + $0x50] ss:$8 sps:$4 sm:$0xff]   ;;  %v1252_v8 = vld [vmem:[%s1666_s30 + $0x44] ss:$8 sps:$4 sm:$0xff]   ;;  %v1254_v9 = vld [vmem:[%s1666_s30 + $0x40] ss:$8 sps:$4 sm:$0xff]  }
  0x5b   : > { %440 = vmatprep.subr.bf16.mxu0 %v1246_v4  ;;  %v1255_v10 = vld [vmem:[%s1666_s30 + $0x34] ss:$8 sps:$4 sm:$0xff]   ;;  %v1257_v11 = vld [vmem:[%s1666_s30 + $0x30] ss:$8 sps:$4 sm:$0xff]   ;;  %v1258_v12 = vld [vmem:[%s1666_s30 + $0x24] ss:$8 sps:$4 sm:$0xff]  }
  0x5c   : > { %v1260_v13 = vld [vmem:[%s1666_s30 + $0x20] ss:$8 sps:$4 sm:$0xff]   ;;  %v1261_v14 = vld [vmem:[%s1666_s30 + $0x14] ss:$8 sps:$4 sm:$0xff]   ;;  %v1263_v15 = vld [vmem:[%s1666_s30 + $0x10] ss:$8 sps:$4 sm:$0xff]  }
  0x5d   : > { %v1264_v16 = vld [vmem:[%s1666_s30 + $0x4] ss:$8 sps:$4 sm:$0xff]   ;;  %v1266_v17 = vld [vmem:[%s1666_s30] ss:$8 sps:$4 sm:$0xff]   ;;  %v1269_v20 = vld [vmem:[#allocation3 + $0x10] sm:$0xff]   ;;  %p1102_p2 = scmp.ne.s32.totalorder %s1503_s15, 2 }
  0x5e   : > { %441 = vmatpush1.bf16.msra.mxu0 %v1248_v5  ;;  %v1268_v19 = vld [vmem:[#allocation3 + $0x8] sm:$0xff]   ;;  %v1270_v21 = vld [vmem:[#allocation3 + $0x18] sm:$0xff]   ;;  %v1271_v22 = vld [vmem:[#allocation3 + $0x20] sm:$0xff]  }
  0x5f   : > { %442 = vmatprep.subr.bf16.mxu0 %v1249_v6  ;;  %v1272_v23 = vld [vmem:[#allocation3 + $0x28] sm:$0xff]   ;;  %v1273_v24 = vld [vmem:[#allocation3 + $0x30] sm:$0xff]   ;;  %v1274_v25 = vld [vmem:[#allocation3 + $0x38] sm:$0xff]  }
  0x60   : > { %v1275_v26 = vld [vmem:[%s1672_s27 + $0x38] sm:$0xff]   ;;  %v1276_v27 = vld [vmem:[%s1672_s27 + $0x30] sm:$0xff]   ;;  %v1277_v28 = vld [vmem:[%s1672_s27 + $0x28] sm:$0xff]  }
  0x61   : > { %1125 = vmatprep.subr.bf16.mxu1 %v1275_v26  ;;  %v1278_v29 = vld [vmem:[%s1672_s27 + $0x20] sm:$0xff]   ;;  %v1279_v30 = vld [vmem:[%s1672_s27 + $0x18] sm:$0xff]   ;;  %v1280_v31 = vld [vmem:[%s1672_s27 + $0x10] sm:$0xff]  }
  0x62   : > { %443 = vmatpush1.bf16.msra.mxu0 %v1251_v7  ;;  %1126 = vmatpush3.bf16.msra.mxu1 %v1275_v26  ;;  %v1281_v32 = vld [vmem:[%s1672_s27 + $0x8] sm:$0xff]   ;;  %v1282_v33 = vld [vmem:[%s1672_s27] sm:$0xff]  }
  0x63   : > { %444 = vmatprep.subr.bf16.mxu0 %v1252_v8  ;;  %1127 = vmatprep.subr.bf16.mxu1 %v1276_v27 }
  0x66   : > { %445 = vmatpush1.bf16.msra.mxu0 %v1254_v9  ;;  %1128 = vmatpush3.bf16.msra.mxu1 %v1276_v27 }
  0x67   : > { %446 = vmatprep.subr.bf16.mxu0 %v1255_v10  ;;  %1129 = vmatprep.subr.bf16.mxu1 %v1277_v28 }
  0x6a   : > { %447 = vmatpush1.bf16.msra.mxu0 %v1257_v11  ;;  %1130 = vmatpush3.bf16.msra.mxu1 %v1277_v28 }
  0x6b   : > { %448 = vmatprep.subr.bf16.mxu0 %v1258_v12  ;;  %1131 = vmatprep.subr.bf16.mxu1 %v1278_v29 }
  0x6e   : > { %449 = vmatpush1.bf16.msra.mxu0 %v1260_v13  ;;  %1132 = vmatpush3.bf16.msra.mxu1 %v1278_v29 }
  0x6f   : > { %450 = vmatprep.subr.bf16.mxu0 %v1261_v14  ;;  %1133 = vmatprep.subr.bf16.mxu1 %v1279_v30 }
  0x72   : > { %451 = vmatpush1.bf16.msra.mxu0 %v1263_v15  ;;  %1134 = vmatpush3.bf16.msra.mxu1 %v1279_v30 }
  0x73   : > { %452 = vmatprep.subr.bf16.mxu0 %v1264_v16  ;;  %1135 = vmatprep.subr.bf16.mxu1 %v1280_v31 }
  0x76   : > { %453 = vmatpush1.bf16.msra.mxu0 %v1266_v17  ;;  %1136 = vmatpush3.bf16.msra.mxu1 %v1280_v31 }
  0x77   : > { %1137 = vmatprep.subr.bf16.mxu1 %v1281_v32 }
  0x79   : > { %471 = vmatmul.mubr.bf16.vlgmr.msra.gmra.mxu0 %v1267_v18 }
  0x7a   : > { %480 = vmatprep.mubr.bf16.mxu0 %v1521_v3  ;;  %1138 = vmatpush3.bf16.msra.mxu1 %v1281_v32 }
  0x7b   : > { %1139 = vmatprep.subr.bf16.mxu1 %v1282_v33 }
  0x7e   : > { %1140 = vmatpush3.bf16.msra.mxu1 %v1282_v33 }
  0x81   : > { %481 = vmatmul.mubr.bf16.gmra.mxu0 %v1268_v19 }
  0x82   : > { %490 = vmatprep.mubr.bf16.mxu0 %v1521_v3 }
  0x89   : > { %491 = vmatmul.mubr.bf16.gmra.mxu0 %v1269_v20 }
  0x8a   : > { %500 = vmatprep.mubr.bf16.mxu0 %v1521_v3 }
  0x91   : > { %501 = vmatmul.mubr.bf16.gmra.mxu0 %v1270_v21 }
  0x92   : > { %510 = vmatprep.mubr.bf16.mxu0 %v1521_v3 }
  0x99   : > { %511 = vmatmul.mubr.bf16.gmra.mxu0 %v1271_v22 }
  0x9a   : > { %520 = vmatprep.mubr.bf16.mxu0 %v1521_v3 }
  0xa1   : > { %521 = vmatmul.mubr.bf16.gmra.mxu0 %v1272_v23 }
  0xa2   : > { %530 = vmatprep.mubr.bf16.mxu0 %v1521_v3 }
  0xa9   : > { %531 = vmatmul.mubr.bf16.gmra.mxu0 %v1273_v24 }
  0xaa   : > { %540 = vmatprep.mubr.bf16.mxu0 %v1521_v3 }
  0xb1   : > { %541 = vmatmul.mubr.bf16.gmra.mxu0 %v1274_v25 }
 0x139   : > { %v472_v34 = vpop.f32.mrf.mxu0 }
 0x13a   : > { %v1078_v35 = vmul.f32 -1.442695, %v472_v34 }
 0x13b   : > { %v474_v36 = vpop.f32.mrf.mxu0 }
 0x13c   : > { %1283 = vpow2.f32 %v1078_v35 }
 0x13d   : > { %v476_v37 = vpop.f32.mrf.mxu0 }
 0x13e   : > { %v1079_v38 = vmul.f32 -1.442695, %v476_v37 }
 0x13f   : > { %v478_v39 = vpop.f32.mrf.mxu0 }
 0x140   : > { %1285 = vpow2.f32 %v1079_v38 }
 0x141   : > { %v1699_v40 = vpop.f32.mrf.mxu0 }
 0x142   : > { %v1080_v41 = vmul.f32 -1.442695, %v1699_v40 }
 0x143   : > { %v1702_v42 = vpop.f32.mrf.mxu0 }
 0x144   : > { %1287 = vpow2.f32 %v1080_v41 }
 0x145   : > { %v1704_v43 = vpop.f32.mrf.mxu0 }
 0x146   : > { %v1081_v44 = vmul.f32 -1.442695, %v1704_v43 }
 0x147   : > { %v1707_v45 = vpop.f32.mrf.mxu0 }
 0x148   : > { %1289 = vpow2.f32 %v1081_v44 }
 0x149   : > { %v1284_v46 = vpop.eup %1283  ;;  %v1709_v47 = vpop.f32.mrf.mxu0 }
 0x14a   : > { %v599_v48 = vadd.f32 1.0, %v1284_v46  ;;  %v1082_v49 = vmul.f32 -1.442695, %v1709_v47 }
 0x14b   : > { %v1712_v50 = vpop.f32.mrf.mxu0 }
 0x14c   : > { %1291 = vrcp.f32 %v599_v48 }
 0x14d   : > { %v1286_v51 = vpop.eup %1285  ;;  %1293 = vpow2.f32 %v1082_v49  ;;  %v1714_v52 = vpop.f32.mrf.mxu0 }
 0x14e   : > { %v600_v53 = vadd.f32 1.0, %v1286_v51  ;;  %v1083_v54 = vmul.f32 -1.442695, %v1714_v52 }
 0x14f   : > { %v1717_v55 = vpop.f32.mrf.mxu0 }
 0x150   : > { %1295 = vrcp.f32 %v600_v53 }
 0x151   : > { %v1288_v56 = vpop.eup %1287  ;;  %1297 = vpow2.f32 %v1083_v54  ;;  %v1719_v57 = vpop.f32.mrf.mxu0 }
 0x152   : > { %v601_v58 = vadd.f32 1.0, %v1288_v56  ;;  %v1084_v59 = vmul.f32 -1.442695, %v1719_v57 }
 0x153   : > { %v1722_v60 = vpop.f32.mrf.mxu0 }
 0x154   : > { %1299 = vrcp.f32 %v601_v58 }
 0x155   : > { %v1290_v61 = vpop.eup %1289  ;;  %1301 = vpow2.f32 %v1084_v59  ;;  %v1724_v62 = vpop.f32.mrf.mxu0 }
 0x156   : > { %v602_v63 = vadd.f32 1.0, %v1290_v61  ;;  %v1085_v0 = vmul.f32 -1.442695, %v1724_v62 }
 0x157   : > { %v1727_v1 = vpop.f32.mrf.mxu0 }
 0x158   : > { %1303 = vrcp.f32 %v602_v63 }
 0x159   : > { %v1292_v2 = vpop.eup %1291  ;;  %1305 = vpow2.f32 %v1085_v0  ;;  %v1729_v3 = vpop.f32.mrf.mxu0 }
 0x15a   : > { %v1294_v4 = vpop.eup %1293  ;;  %v1086_v5 = vmul.f32 -1.442695, %v1729_v3  ;;  %v647_v8 = vmul.f32 %v1292_v2, %v472_v34 }
 0x15b   : > { %v603_v6 = vadd.f32 1.0, %v1294_v4  ;;  %v1732_v7 = vpop.f32.mrf.mxu0 }
 0x15c   : > { %1307 = vpow2.f32 %v1086_v5  ;;  %v663_v16 = vmul.f32 %v647_v8, %v474_v36 }
 0x15d   : > { %v1296_v9 = vpop.eup %1295  ;;  %1309 = vrcp.f32 %v603_v6  ;;  %v1734_v10 = vpop.f32.mrf.mxu0 }
 0x15e   : > { %v1298_v11 = vpop.eup %1297  ;;  %v648_v12 = vmul.f32 %v1296_v9, %v476_v37  ;;  %v1087_v13 = vmul.f32 -1.442695, %v1734_v10 }
 0x15f   : > { %v604_v14 = vadd.f32 1.0, %v1298_v11  ;;  %v1737_v15 = vpop.f32.mrf.mxu0 }
 0x160   : > { %v664_v17 = vmul.f32 %v648_v12, %v478_v39  ;;  %1311 = vpow2.f32 %v1087_v13 }
 0x161   : > { %v1300_v18 = vpop.eup %1299  ;;  %1313 = vrcp.f32 %v604_v14  ;;  %v1739_v19 = vpop.f32.mrf.mxu0 }
 0x162   : > { %v1302_v20 = vpop.eup %1301  ;;  %v1088_v21 = vmul.f32 -1.442695, %v1739_v19  ;;  %v695_v22 = vpack.c.bf16 %v664_v17, %v663_v16  ;;  %v649_v25 = vmul.f32 %v1300_v18, %v1699_v40 }
 0x163   : > { %v605_v23 = vadd.f32 1.0, %v1302_v20  ;;  %v1742_v24 = vpop.f32.mrf.mxu0 }
 0x164   : > { %1315 = vpow2.f32 %v1088_v21  ;;  %1141 = vmatprep.mubr.bf16.mxu1 %v695_v22  ;;  %v665_v33 = vmul.f32 %v649_v25, %v1702_v42 }
 0x165   : > { %v1304_v26 = vpop.eup %1303  ;;  %1317 = vrcp.f32 %v605_v23  ;;  %v1745_v27 = vpop.f32.mrf.mxu0 }
 0x166   : > { %v1306_v28 = vpop.eup %1305  ;;  %v650_v29 = vmul.f32 %v1304_v26, %v1704_v43  ;;  %v1089_v30 = vmul.f32 -1.442695, %v1745_v27 }
 0x167   : > { %v606_v31 = vadd.f32 1.0, %v1306_v28  ;;  %v1749_v32 = vpop.f32.mrf.mxu0 }
 0x168   : > { %v666_v34 = vmul.f32 %v650_v29, %v1707_v45  ;;  %1319 = vpow2.f32 %v1089_v30 }
 0x169   : > { %v1308_v35 = vpop.eup %1307  ;;  %1321 = vrcp.f32 %v606_v31  ;;  %v1753_v36 = vpop.f32.mrf.mxu0 }
 0x16a   : > { %v1310_v37 = vpop.eup %1309  ;;  %v696_v38 = vpack.c.bf16 %v666_v34, %v665_v33  ;;  %v607_v39 = vadd.f32 1.0, %v1308_v35  ;;  %v1090_v40 = vmul.f32 -1.442695, %v1753_v36 }
 0x16b   : > { %v1756_v41 = vpop.f32.mrf.mxu0  ;;  %v651_v44 = vmul.f32 %v1310_v37, %v1709_v47 }
 0x16c   : > { %1323 = vrcp.f32 %v607_v39  ;;  %1142 = vmatmul.mubr.bf16.vlgmr.msra.gmra.mxu1 %v696_v38 }
 0x16d   : > { %v1312_v43 = vpop.eup %1311  ;;  %1325 = vpow2.f32 %v1090_v40  ;;  %v1759_v42 = vpop.f32.mrf.mxu0  ;;  %v667_v54 = vmul.f32 %v651_v44, %v1712_v50 }
 0x16e   : > { %v1314_v45 = vpop.eup %1313  ;;  %v608_v46 = vadd.f32 1.0, %v1312_v43  ;;  %v1091_v48 = vmul.f32 -1.442695, %v1759_v42 }
 0x16f   : > { %v652_v49 = vmul.f32 %v1314_v45, %v1714_v52  ;;  %v538_v51 = vpop.f32.mrf.mxu0  ;;  %v681_v45 = vld [vmem:[#allocation2 + $0x58] sm:$0xff] }
 0x170   : > { %1327 = vrcp.f32 %v608_v46 }
 0x171   : > { %v1316_v53 = vpop.eup %1315  ;;  %v668_v56 = vmul.f32 %v652_v49, %v1717_v55  ;;  %1329 = vpow2.f32 %v1091_v48  ;;  %v542_v58 = vpop.f32.mrf.mxu0 }
 0x172   : > { %v1318_v59 = vpop.eup %1317  ;;  %v609_v47 = vadd.f32 1.0, %v1316_v53  ;;  %v1092_v61 = vmul.f32 -1.442695, %v542_v58  ;;  %v680_v53 = vld [vmem:[#allocation2] sm:$0xff] }
 0x173   : > { %v697_v63 = vpack.c.bf16 %v668_v56, %v667_v54  ;;  %v544_v0 = vpop.f32.mrf.mxu0  ;;  %v653_v4 = vmul.f32 %v1318_v59, %v1719_v57  ;;  %v685_v59 = vld [vmem:[#allocation2 + $0x8] sm:$0xff] }
 0x174   : > { %1331 = vrcp.f32 %v609_v47 }
 0x175   : > { %v1320_v2 = vpop.eup %1319  ;;  %1333 = vpow2.f32 %v1092_v61  ;;  %1145 = vmatprep.mubr.bf16.mxu1 %v697_v63  ;;  %v546_v52 = vpop.f32.mrf.mxu0  ;;  %v669_v9 = vmul.f32 %v653_v4, %v1722_v60  ;;  %v683_v61 = vld [vmem:[#allocation2 + $0x50] sm:$0xff] }
 0x176   : > { %v1322_v5 = vpop.eup %1321  ;;  %v610_v6 = vadd.f32 1.0, %v1320_v2  ;;  %v1093_v8 = vmul.f32 -1.442695, %v546_v52  ;;  %v686_v2 = vld [vmem:[#allocation2 + $0x48] sm:$0xff] }
 0x177   : > { %v654_v50 = vmul.f32 %v1322_v5, %v1724_v62  ;;  %v548_v40 = vpop.f32.mrf.mxu0  ;;  %v684_v5 = vld [vmem:[#allocation2 + $0x68] sm:$0xff] }
 0x178   : > { %1335 = vrcp.f32 %v610_v6 }
 0x179   : > { %v1324_v55 = vpop.eup %1323  ;;  %v670_v11 = vmul.f32 %v654_v50, %v1727_v1  ;;  %1337 = vpow2.f32 %v1093_v8 }
 0x17a   : > { %v1326_v12 = vpop.eup %1325  ;;  %v655_v57 = vmul.f32 %v1324_v55, %v1729_v3  ;;  %v689_v55 = vld [vmem:[#allocation2 + $0x10] sm:$0xff] }
 0x17b   : > { %v698_v13 = vpack.c.bf16 %v670_v11, %v669_v9  ;;  %v611_v14 = vadd.f32 1.0, %v1326_v12  ;;  %v687_v11 = vld [vmem:[#allocation2 + $0x40] sm:$0xff] }
 0x17c   : > { %v671_v62 = vmul.f32 %v655_v57, %v1732_v7 }
 0x17d   : > { %v1328_v16 = vpop.eup %1327  ;;  %1339 = vrcp.f32 %v611_v14  ;;  %1146 = vmatmul.mubr.bf16.gmra.mxu1 %v698_v13  ;;  %v690_v14 = vld [vmem:[#allocation2 + $0x38] sm:$0xff] }
 0x17e   : > { %v1330_v17 = vpop.eup %1329  ;;  %v656_v18 = vmul.f32 %v1328_v16, %v1734_v10 }
 0x17f   : > { %v612_v20 = vadd.f32 1.0, %v1330_v17  ;;  %v688_v17 = vld [vmem:[#allocation2 + $0x20] sm:$0xff] }
 0x180   : > { %v672_v21 = vmul.f32 %v656_v18, %v1737_v15 }
 0x181   : > { %v1332_v60 = vpop.eup %1331  ;;  %1341 = vrcp.f32 %v612_v20 }
 0x182   : > { %v1334_v1 = vpop.eup %1333  ;;  %v699_v22 = vpack.c.bf16 %v672_v21, %v671_v62  ;;  %v657_v25 = vmul.f32 %v1332_v60, %v1739_v19  ;;  %v693_v21 = vld [vmem:[#allocation2 + $0x78] sm:$0xff] }
 0x183   : > { %v613_v23 = vadd.f32 1.0, %v1334_v1  ;;  %v691_v1 = vld [vmem:[#allocation2 + $0x60] sm:$0xff] }
 0x184   : > { %1149 = vmatprep.mubr.bf16.mxu1 %v699_v22  ;;  %v673_v10 = vmul.f32 %v657_v25, %v1742_v24  ;;  %v694_v25 = vld [vmem:[#allocation2 + $0x28] sm:$0xff] }
 0x185   : > { %v1336_v3 = vpop.eup %1335  ;;  %1343 = vrcp.f32 %v613_v23 }
 0x186   : > { %v1338_v26 = vpop.eup %1337  ;;  %v658_v28 = vmul.f32 %v1336_v3, %v1745_v27 }
 0x187   : > { %v614_v29 = vadd.f32 1.0, %v1338_v26 }
 0x188   : > { %v674_v7 = vmul.f32 %v658_v28, %v1749_v32  ;;  %v692_v28 = vld [vmem:[#allocation2 + $0x70] sm:$0xff] }
 0x189   : > { %1345 = vrcp.f32 %v614_v29 }
 0x18a   : > { %v1340_v15 = vpop.eup %1339  ;;  %v700_v30 = vpack.c.bf16 %v674_v7, %v673_v10 }
 0x18b   : > { %v659_v31 = vmul.f32 %v1340_v15, %v1753_v36  ;;  %v679_v36 = vld [vmem:[#allocation2 + $0x30] sm:$0xff] }
 0x18c   : > { %1150 = vmatmul.mubr.bf16.gmra.mxu1 %v700_v30 }
 0x18d   : > { %v675_v34 = vmul.f32 %v659_v31, %v1756_v41 }
 0x18e   : > { %v1342_v33 = vpop.eup %1341 }
 0x18f   : > { %v660_v19 = vmul.f32 %v1342_v33, %v1759_v42  ;;  %v682_v42 = vld [vmem:[#allocation2 + $0x18] sm:$0xff] }
 0x191   : > { %v676_v35 = vmul.f32 %v660_v19, %v538_v51 }
 0x192   : > { %v1344_v37 = vpop.eup %1343 }
 0x193   : > { %v701_v38 = vpack.c.bf16 %v676_v35, %v675_v34  ;;  %v661_v27 = vmul.f32 %v1344_v37, %v542_v58 }
 0x195   : > { %1153 = vmatprep.mubr.bf16.mxu1 %v701_v38  ;;  %v677_v32 = vmul.f32 %v661_v27, %v544_v0 }
 0x196   : > { %v1346_v39 = vpop.eup %1345 }
 0x197   : > { %v662_v24 = vmul.f32 %v1346_v39, %v546_v52 }
 0x199   : > { %v678_v43 = vmul.f32 %v662_v24, %v548_v40 }
 0x19b   : > { %v702_v44 = vpack.c.bf16 %v678_v43, %v677_v32 }
 0x19d   : > { %1154 = vmatmul.mubr.bf16.gmra.mxu1 %v702_v44 }
 0x22c   : > { %v1143_v46 = vpop.f32.mrf.mxu1 }
 0x22d   : > { %v866_v48 = vadd.f32 %v1143_v46, %v681_v45 }
 0x22e   : > { %v801_v49 = vpop.f32.mrf.mxu1 }
 0x22f   : > { %882 = vst [vmem:[#allocation2 + $0x58] sm:$0xff] %v866_v48  ;;  %v864_v41 = vadd.f32 %v801_v49, %v679_v36 }
 0x230   : > { %v1144_v51 = vpop.f32.mrf.mxu1 }
 0x231   : > { %880 = vst [vmem:[#allocation2 + $0x30] sm:$0xff] %v864_v41  ;;  %v867_v54 = vadd.f32 %v1144_v51, %v682_v42 }
 0x232   : > { %v804_v56 = vpop.f32.mrf.mxu1 }
 0x233   : > { %883 = vst [vmem:[#allocation2 + $0x18] sm:$0xff] %v867_v54  ;;  %v865_v58 = vadd.f32 %v804_v56, %v680_v53 }
 0x235   : > { %881 = vst [vmem:[#allocation2] sm:$0xff] %v865_v58 }
 0x23d   : > { %v1147_v47 = vpop.f32.mrf.mxu1 }
 0x23e   : > { %v870_v63 = vadd.f32 %v1147_v47, %v685_v59 }
 0x23f   : > { %v817_v0 = vpop.f32.mrf.mxu1 }
 0x240   : > { %886 = vst [vmem:[#allocation2 + $0x8] sm:$0xff] %v870_v63  ;;  %v868_v4 = vadd.f32 %v817_v0, %v683_v61 }
 0x241   : > { %v1148_v52 = vpop.f32.mrf.mxu1 }
 0x242   : > { %884 = vst [vmem:[#allocation2 + $0x50] sm:$0xff] %v868_v4  ;;  %v871_v6 = vadd.f32 %v1148_v52, %v686_v2 }
 0x243   : > { %v820_v8 = vpop.f32.mrf.mxu1 }
 0x244   : > { %887 = vst [vmem:[#allocation2 + $0x48] sm:$0xff] %v871_v6  ;;  %v869_v50 = vadd.f32 %v820_v8, %v684_v5 }
 0x246   : > { %885 = vst [vmem:[#allocation2 + $0x68] sm:$0xff] %v869_v50 }
 0x24c   : > { %v1151_v9 = vpop.f32.mrf.mxu1 }
 0x24d   : > { %v874_v12 = vadd.f32 %v1151_v9, %v689_v55 }
 0x24e   : > { %v833_v13 = vpop.f32.mrf.mxu1 }
 0x24f   : > { %890 = vst [vmem:[#allocation2 + $0x10] sm:$0xff] %v874_v12  ;;  %v872_v57 = vadd.f32 %v833_v13, %v687_v11 }
 0x250   : > { %v1152_v16 = vpop.f32.mrf.mxu1 }
 0x251   : > { %888 = vst [vmem:[#allocation2 + $0x40] sm:$0xff] %v872_v57  ;;  %v875_v18 = vadd.f32 %v1152_v16, %v690_v14 }
 0x252   : > { %v836_v20 = vpop.f32.mrf.mxu1 }
 0x253   : > { %891 = vst [vmem:[#allocation2 + $0x38] sm:$0xff] %v875_v18  ;;  %v873_v62 = vadd.f32 %v836_v20, %v688_v17 }
 0x255   : > { %889 = vst [vmem:[#allocation2 + $0x20] sm:$0xff] %v873_v62 }
 0x25d   : > { %v1155_v60 = vpop.f32.mrf.mxu1 }
 0x25e   : > { %v878_v22 = vadd.f32 %v1155_v60, %v693_v21 }
 0x25f   : > { %v849_v23 = vpop.f32.mrf.mxu1 }
 0x260   : > { %894 = vst [vmem:[#allocation2 + $0x78] sm:$0xff] %v878_v22  ;;  %v876_v3 = vadd.f32 %v849_v23, %v691_v1 }
 0x261   : > { %v1156_v26 = vpop.f32.mrf.mxu1 }
 0x262   : > { %892 = vst [vmem:[#allocation2 + $0x60] sm:$0xff] %v876_v3  ;;  %v879_v29 = vadd.f32 %v1156_v26, %v694_v25  ;;  %899 = sbr.rel (%p1102_p2) target bundleno = 624 (0x270), region = 52 }
 0x263   : > { %v852_v10 = vpop.f32.mrf.mxu1 }
 0x264   : > { %895 = vst [vmem:[#allocation2 + $0x28] sm:$0xff] %v879_v29  ;;  %v877_v7 = vadd.f32 %v852_v10, %v692_v28 }
 0x266   : > { %893 = vst [vmem:[#allocation2 + $0x70] sm:$0xff] %v877_v7 }
 0x267   : > { %v900_v15 = vld [vmem:[#allocation2 + $0x30] sm:$0xff]  ;;  %v901_v30 = vld [vmem:[#allocation2] sm:$0xff]  ;;  %v902_v31 = vld [vmem:[#allocation2 + $0x58] sm:$0xff] }
 0x268   : > { %916 = vst [vmem:[#allocation9] sm:$0xff] %v900_v15  ;;  %917 = vst [vmem:[#allocation9 + $0x8] sm:$0xff] %v901_v30  ;;  %v903_v33 = vld [vmem:[#allocation2 + $0x18] sm:$0xff]  ;;  %v904_v19 = vld [vmem:[#allocation2 + $0x50] sm:$0xff] }
 0x269   : > { %918 = vst [vmem:[#allocation9 + $0x10] sm:$0xff] %v902_v31  ;;  %v905_v34 = vld [vmem:[#allocation2 + $0x68] sm:$0xff]  ;;  %919 = vst [vmem:[#allocation9 + $0x18] sm:$0xff] %v903_v33  ;;  %v908_v38 = vld [vmem:[#allocation2 + $0x40] sm:$0xff] }
 0x26a   : > { %920 = vst [vmem:[#allocation9 + $0x20] sm:$0xff] %v904_v19  ;;  %921 = vst [vmem:[#allocation9 + $0x28] sm:$0xff] %v905_v34  ;;  %v906_v35 = vld [vmem:[#allocation2 + $0x8] sm:$0xff]  ;;  %v909_v27 = vld [vmem:[#allocation2 + $0x20] sm:$0xff] }
 0x26b   : > { %v907_v37 = vld [vmem:[#allocation2 + $0x48] sm:$0xff]  ;;  %922 = vst [vmem:[#allocation9 + $0x30] sm:$0xff] %v906_v35  ;;  %924 = vst [vmem:[#allocation9 + $0x40] sm:$0xff] %v908_v38  ;;  %v910_v39 = vld [vmem:[#allocation2 + $0x10] sm:$0xff] }
 0x26c   : > { %923 = vst [vmem:[#allocation9 + $0x38] sm:$0xff] %v907_v37  ;;  %v911_v24 = vld [vmem:[#allocation2 + $0x38] sm:$0xff]  ;;  %925 = vst [vmem:[#allocation9 + $0x48] sm:$0xff] %v909_v27  ;;  %v912_v40 = vld [vmem:[#allocation2 + $0x60] sm:$0xff] }
 0x26d   : > { %926 = vst [vmem:[#allocation9 + $0x50] sm:$0xff] %v910_v39  ;;  %927 = vst [vmem:[#allocation9 + $0x58] sm:$0xff] %v911_v24  ;;  %v913_v32 = vld [vmem:[#allocation2 + $0x70] sm:$0xff]  ;;  %v914_v43 = vld [vmem:[#allocation2 + $0x78] sm:$0xff] }
 0x26e   : > { %928 = vst [vmem:[#allocation9 + $0x60] sm:$0xff] %v912_v40  ;;  %929 = vst [vmem:[#allocation9 + $0x68] sm:$0xff] %v913_v32  ;;  %v915_v44 = vld [vmem:[#allocation2 + $0x28] sm:$0xff] }
 0x26f   : > { %930 = vst [vmem:[#allocation9 + $0x70] sm:$0xff] %v914_v43  ;;  %931 = vst [vmem:[#allocation9 + $0x78] sm:$0xff] %v915_v44 }
 0x270 PF: > { %p1183_p5 = scmp.eq.s32.totalorder %s1609_s22, 2  ;;  %s1522_s15 = smov [#allocation9]  }
 0x271   : > { %s941_s23 = sshll.u32 %s1522_s15, 4  ;;  %s942_s23 = int_to_ptr.vmem [resolvable:$true] %s941_s23 }
 0x272   : > { %s1429_s4 = scalar_lea.vmem %s942_s23, 2048  ;;  %p1436_p7 = scmp.lt.s32.totalorder %s942_s23, %s942_s23 }
 0x273   : > { %p1430_p8 = scmp.ne.s32.totalorder %s942_s23, %s1429_s4  ;;  %p1437_p9 = scmp.lt.s32.totalorder %s1429_s4, %s1429_s4 }
 0x275   : > { %p1431_p10 = pnand %p1430_p8, %p1183_p5  ;;  %p1438_p11 = por %p1437_p9, %p1436_p7 }
 0x277   : > { %p1432_p4 = pneg %p1431_p10 }
 0x279   : > { %p1439_p12 = pnand %p1438_p11, %p1432_p4 }
 0x27b   : > { %1442 = shalt.err (!%p1439_p12)
}
 0x27c   : > { %s1523_s5 = smov 128   ;;  %s1524_s7 = smov 8  }
 0x27d   : > { %1166 = dma.vmem_to_hbm [thread:$0]  (%p1183_p5), %s942_s23, 2048, %s1814_s3, [#allocation5], %s1523_s5, %s1523_s5, %s1524_s7  }
 0x27e   : > { %1486 = dma.done.wait (%p1183_p5), [#allocation5], 2048  }
 0x27f   : > { %1488 = vsyncadd (%p1183_p5), [#allocation5], 4294965248 }
 0x280 PF: > { %s18_s17 = sadd.s32 1, %s1511_s17   ;;  %s1819_s12 = smov %s1495_s13 }
 0x281   : > { %p15_p0 = scmp.ge.s32.totalorder %s18_s17, 5   ;;  %s1820_s13 = smov %s1499_s14 }
 0x282   : > { %s1821_s14 = smov %s1589_s24  ;;  %s1822_s15 = smov %s1507_s16 }
 0x283   : > { %s1823_s16 = smov %s1825_s18  ;;  %17 = sbr.rel (!%p15_p0) target bundleno = 6 (0x6), region = 95 }
 0x288   :  { %957 = vsyncpa [#allocation4], 1 }
 0x289   :  { %959 = vsyncpa [#allocation4 + $0x1], 1 }
 0x28a   :  { %960 = vsyncpa [#allocation7], 1 }
 0x28b   :  { %962 = vsyncpa [#allocation7 + $0x1], 1 }
 0x28c   :  { %963 = vsyncpa [#allocation5], 1 }
 0x28d   :  { %965 = vsyncpa [#allocation5 + $0x1], 1 }

</bundles_post_ra>
